<compile_context>
chip_gen: v7x
topology: tpu7x:2x2x1
jax: 0.10.0
libtpu: 0.0.40
codegen_flags: <defaults>
</compile_context>

<pallas_src>
import functools

import jax
import jax.numpy as jnp
from jax.experimental import pallas as pl
from jax.experimental.pallas import tpu as pltpu

LN_EPS = 1e-5


def _round_up(x, m):
    return (x + m - 1) // m * m


@functools.lru_cache(maxsize=1)
def _vmem_capacity_bytes():
    """Physical VMEM per core (64 MiB v7x, 128 MiB v5e/v6e); cached once."""
    try:
        return int(pltpu.get_tpu_info().vmem_capacity_bytes)
    except Exception:
        return 128 * 1024 * 1024


def _feature_mixer_kernel(x_ref, w1_ref, b1_ref, w2_ref, b2_ref, o_ref, *,
                          inv_d, d_true):
    """One (rt, Dp) row tile of the feature mixer.

    x_ref:  (rt, Dp)  input rows (lanes >= d_true, if any, are garbage -> masked)
    w1_ref: (Dp, Hp)  gamma-folded W1^T (matmul dtype)
    b1_ref: (1, Hp)   beta-folded b1 (f32)
    w2_ref: (Hp, Dp)  W2^T (matmul dtype)
    b2_ref: (1, Dp)   b2 (f32)
    o_ref:  (rt, Dp)  output rows (OOB rows/lanes dropped by Pallas on store)
    """
    xf = x_ref[...].astype(jnp.float32)

    # If the feature dim was rounded up to a lane multiple, zero the padded
    # lanes so LayerNorm statistics (computed with the true D via inv_d) and
    # the residual are exact; padded weight rows/cols are zero so the padded
    # lanes contribute nothing to the matmuls.
    if d_true != x_ref.shape[-1]:
        lane = jax.lax.broadcasted_iota(jnp.int32, xf.shape, 1)
        xf = jnp.where(lane < d_true, xf, 0.0)

    # LayerNorm statistics over the true feature dim (E[x^2]-mean^2 form).
    s = jnp.sum(xf, axis=-1, keepdims=True)
    mean = s * inv_d
    sq = jnp.sum(xf * xf, axis=-1, keepdims=True)
    var = jnp.maximum(sq * inv_d - mean * mean, 0.0)
    inv = jax.lax.rsqrt(var + LN_EPS)
    y = (xf - mean) * inv  # gamma/beta already folded into w1/b1

    # Linear -> ReLU -> Linear on the MXU: low-precision operands, f32 accum.
    h = jnp.dot(y.astype(w1_ref.dtype), w1_ref[...],
                preferred_element_type=jnp.float32) + b1_ref[...]
    h = jnp.maximum(h, 0.0)
    out = jnp.dot(h.astype(w2_ref.dtype), w2_ref[...],
                  preferred_element_type=jnp.float32) + b2_ref[...]

    # Residual: reuse the already-loaded f32 copy of x (saves a vld pass and,
    # for bf16 activations, rounds exactly once).
    o_ref[...] = (xf + out).astype(o_ref.dtype)


def feature_mixer_layer(x, gamma, beta, w1, b1, w2, b2, *,
                        row_tile=1024,
                        matmul_dtype=jnp.bfloat16,
                        vmem_limit_bytes=None):
    """Applies the FeatureMixerLayer forward pass.

    Args:
      x:  (B, N, D) input.
      gamma, beta: (D,) LayerNorm affine params.
      w1: (H, D) first linear weight (PyTorch layout: out x in).
      b1: (H,)   first linear bias.
      w2: (D, H) second linear weight (PyTorch layout: out x in).
      b2: (D,)   second linear bias.
    Returns:
      (B, N, D) output, same dtype as x.
    """
    B, N, D = x.shape
    H = w1.shape[0]
    assert w1.shape == (H, D) and w2.shape == (D, H)
    rows = B * N

    # Lane-dense padding of the feature / hidden dims (weights only; the
    # activation stream is never padded or sliced in HBM).
    Dp = _round_up(D, 128)
    Hp = _round_up(H, 128)

    f32 = jnp.float32
    x2 = x.reshape(rows, D)

    # Fold the LayerNorm affine into the first linear:
    #   (c*inv*gamma + beta) @ W1^T + b1
    #     == (c*inv) @ (gamma[:,None] * W1^T) + (beta @ W1^T + b1)
    w1_t = jnp.transpose(w1).astype(f32)                # (D, H), "in x out"
    w2_t = jnp.transpose(w2).astype(f32)                # (H, D)
    w1_eff = gamma.astype(f32)[:, None] * w1_t          # (D, H)
    b1_eff = b1.astype(f32) + beta.astype(f32) @ w1_t   # (H,)
    b2_eff = b2.astype(f32)                             # (D,)

    if Dp != D or Hp != H:
        # Zero padding so padded lanes contribute nothing / stay exactly zero.
        w1_eff = jnp.pad(w1_eff, ((0, Dp - D), (0, Hp - H)))
        w2_t = jnp.pad(w2_t, ((0, Hp - H), (0, Dp - D)))
        b1_eff = jnp.pad(b1_eff, (0, Hp - H))
        b2_eff = jnp.pad(b2_eff, (0, Dp - D))
    w1_p = w1_eff.astype(matmul_dtype)                  # (Dp, Hp)
    w2_p = w2_t.astype(matmul_dtype)                    # (Hp, Dp)
    b1_p = b1_eff.reshape(1, Hp)
    b2_p = b2_eff.reshape(1, Dp)

    x_bytes = jnp.dtype(x.dtype).itemsize
    w_bytes = jnp.dtype(matmul_dtype).itemsize

    # Row tile: respect the dtype's sublane packing, fill MXU M tiles (256
    # multiples) when more than one grid step is needed, and keep the honest
    # VMEM working set within the generation's capacity.
    sub = {1: 32, 2: 16}.get(x_bytes, 8)
    rows_sub = _round_up(rows, sub)
    rt = min(row_tile, rows_sub)
    if rt < rows_sub:
        rt = _round_up(rt, 256)

    def _est(rt_):
        # x/out tiles (double-buffered) + weights (2 buffers allocated, but
        # only fetched once thanks to the constant index_map) + biases +
        # in-body f32 intermediates (xf, out: rt*Dp; h: rt*Hp) + low-precision
        # cast copies of y and h.
        return (2 * 2 * rt_ * Dp * x_bytes
                + 2 * 2 * Dp * Hp * w_bytes
                + 2 * 4 * (Hp + Dp)
                + 4 * rt_ * (2 * Dp + Hp)
                + w_bytes * rt_ * (Dp + Hp))

    vmem_cap = _vmem_capacity_bytes()
    budget = int(0.7 * vmem_cap)
    while rt > 256 and _est(rt) > budget:
        rt -= 256

    num_tiles = pl.cdiv(rows, rt)
    if num_tiles == 1 and rt > 256:
        # Keep at least two grid steps so both TensorCores get work on v7x;
        # on single-TC chips this only adds one ~0.35us grid step.
        rt = _round_up(pl.cdiv(rt, 2), 256)
        num_tiles = pl.cdiv(rows, rt)

    est = _est(rt)
    if vmem_limit_bytes is None and est > int(0.8 * 16 * 1024 * 1024):
        # 16 MiB is the smallest default scoped limit (v5e); cap at 80% of the
        # physical capacity (so <= ~51 MiB on v7x, ~102 MiB on v5e/v6e).
        cap = int(0.8 * vmem_cap)
        vmem_limit_bytes = min(max(int(est * 1.5), 32 * 1024 * 1024), cap)

    cparams = pltpu.CompilerParams(
        dimension_semantics=("parallel",),
        vmem_limit_bytes=vmem_limit_bytes,
    )

    # Advisory cost estimate for XLA scheduling around the custom call.
    cost = pl.CostEstimate(
        flops=4 * rows * Dp * Hp,
        transcendentals=rows,
        bytes_accessed=(2 * rows * D * x_bytes
                        + 2 * Dp * Hp * w_bytes
                        + 4 * (Hp + Dp)),
    )

    out2 = pl.pallas_call(
        functools.partial(_feature_mixer_kernel, inv_d=1.0 / D, d_true=D),
        out_shape=jax.ShapeDtypeStruct((rows, D), x.dtype),
        grid_spec=pltpu.PrefetchScalarGridSpec(
            num_scalar_prefetch=0,
            grid=(num_tiles,),
            in_specs=[
                pl.BlockSpec((rt, Dp), lambda i: (i, 0)),   # x rows
                pl.BlockSpec((Dp, Hp), lambda i: (0, 0)),   # gamma-folded W1^T
                pl.BlockSpec((1, Hp), lambda i: (0, 0)),    # folded b1
                pl.BlockSpec((Hp, Dp), lambda i: (0, 0)),   # W2^T
                pl.BlockSpec((1, Dp), lambda i: (0, 0)),    # b2
            ],
            out_specs=pl.BlockSpec((rt, Dp), lambda i: (i, 0)),
        ),
        compiler_params=cparams,
        cost_estimate=cost,
    )(x2, w1_p, b1_p, w2_p, b2_p)

    return out2.reshape(B, N, D)


def init_params(key, input_dim, mlp_ratio=1):
    """Deterministic parameter init mirroring the PyTorch module.

    Linear weights: trunc_normal(std=0.02), biases zero.
    LayerNorm: gamma=1, beta=0.
    """
    hidden = int(input_dim * mlp_ratio)
    k1, k2 = jax.random.split(key)
    w1 = 0.02 * jax.random.truncated_normal(k1, -2.0, 2.0,
                                            (hidden, input_dim), jnp.float32)
    w2 = 0.02 * jax.random.truncated_normal(k2, -2.0, 2.0,
                                            (input_dim, hidden), jnp.float32)
    b1 = jnp.zeros((hidden,), jnp.float32)
    b2 = jnp.zeros((input_dim,), jnp.float32)
    gamma = jnp.ones((input_dim,), jnp.float32)
    beta = jnp.zeros((input_dim,), jnp.float32)
    return gamma, beta, w1, b1, w2, b2


def _reference(x, gamma, beta, w1, b1, w2, b2):
    """Pure-JAX f32 reference of the PyTorch forward."""
    mean = jnp.mean(x, axis=-1, keepdims=True)
    var = jnp.mean((x - mean) ** 2, axis=-1, keepdims=True)
    y = (x - mean) / jnp.sqrt(var + LN_EPS) * gamma + beta
    h = jnp.maximum(y @ w1.T + b1, 0.0)
    return x + (h @ w2.T + b2)


if __name__ == "__main__":
    # Small, TPU-friendly shapes: batch=2, num_features=64, feature_dim=128.
    B, N, D = 2, 64, 128
    mlp_ratio = 1

    key = jax.random.PRNGKey(0)
    kx, kp = jax.random.split(key)
    x = jax.random.normal(kx, (B, N, D), jnp.float32)
    gamma, beta, w1, b1, w2, b2 = init_params(kp, D, mlp_ratio)

    fn = jax.jit(feature_mixer_layer)
    out = jax.block_until_ready(fn(x, gamma, beta, w1, b1, w2, b2))

    ref = _reference(x, gamma, beta, w1, b1, w2, b2)
    assert out.shape == (B, N, D)
    max_err = float(jnp.max(jnp.abs(out - ref)))
    # Matmul operands run in bf16 (f32 accumulation), so use a ~1e-2 tolerance.
    assert jnp.allclose(out, ref, atol=2e-2, rtol=2e-2), max_err

    print("KERNEL_OK")
</pallas_src>

<mosaic_0001>
module attributes {stable_mosaic.version = 11 : i64} {
  func.func @_feature_mixer_kernel(%arg0: i32, %arg1: memref<128x128xf32, #tpu.memory_space<vmem>>, %arg2: memref<128x128xbf16, #tpu.memory_space<vmem>>, %arg3: memref<1x128xf32, #tpu.memory_space<vmem>>, %arg4: memref<128x128xbf16, #tpu.memory_space<vmem>>, %arg5: memref<1x128xf32, #tpu.memory_space<vmem>>, %arg6: memref<128x128xf32, #tpu.memory_space<vmem>>) attributes {dimension_semantics = [#tpu.dimension_semantics<parallel>], iteration_bounds = array<i64: 1>, scalar_prefetch = 0 : i64, scratch_operands = 0 : i64, tpu.core_type = #tpu.core_type<tc>, window_params = [{transform_indices = @transform_0, window_bounds = array<i64: 128, 128>}, {pipeline_mode = #tpu.pipeline_mode<synchronous>, transform_indices = @transform_1, window_bounds = array<i64: 128, 128>}, {pipeline_mode = #tpu.pipeline_mode<synchronous>, transform_indices = @transform_2, window_bounds = array<i64: 1, 128>}, {pipeline_mode = #tpu.pipeline_mode<synchronous>, transform_indices = @transform_3, window_bounds = array<i64: 128, 128>}, {pipeline_mode = #tpu.pipeline_mode<synchronous>, transform_indices = @transform_4, window_bounds = array<i64: 1, 128>}, {transform_indices = @transform_5, window_bounds = array<i64: 128, 128>}]} {
    %c0 = arith.constant 0 : index
    %c0_0 = arith.constant 0 : index
    %0 = vector.load %arg1[%c0, %c0_0] : memref<128x128xf32, #tpu.memory_space<vmem>>, vector<128x128xf32>
    %cst = arith.constant dense<0.000000e+00> : vector<128xf32>
    %1 = vector.multi_reduction <add>, %0, %cst [1] : vector<128x128xf32> to vector<128xf32>
    %2 = vector.shape_cast %1 : vector<128xf32> to vector<128x1xf32>
    %cst_1 = arith.constant 7.812500e-03 : f32
    %3 = vector.broadcast %cst_1 : f32 to vector<128x1xf32>
    %4 = arith.mulf %2, %3 : vector<128x1xf32>
    %5 = arith.mulf %0, %0 : vector<128x128xf32>
    %cst_2 = arith.constant dense<0.000000e+00> : vector<128xf32>
    %6 = vector.multi_reduction <add>, %5, %cst_2 [1] : vector<128x128xf32> to vector<128xf32>
    %7 = vector.shape_cast %6 : vector<128xf32> to vector<128x1xf32>
    %cst_3 = arith.constant 7.812500e-03 : f32
    %8 = vector.broadcast %cst_3 : f32 to vector<128x1xf32>
    %9 = arith.mulf %7, %8 : vector<128x1xf32>
    %10 = arith.mulf %4, %4 : vector<128x1xf32>
    %11 = arith.subf %9, %10 : vector<128x1xf32>
    %cst_4 = arith.constant 0.000000e+00 : f32
    %12 = vector.broadcast %cst_4 : f32 to vector<128x1xf32>
    %13 = arith.maximumf %11, %12 : vector<128x1xf32>
    %cst_5 = arith.constant 9.99999974E-6 : f32
    %14 = vector.broadcast %cst_5 : f32 to vector<128x1xf32>
    %15 = arith.addf %13, %14 : vector<128x1xf32>
    %16 = math.rsqrt %15 : vector<128x1xf32>
    %17 = vector.broadcast %4 : vector<128x1xf32> to vector<128x128xf32>
    %18 = arith.subf %0, %17 : vector<128x128xf32>
    %19 = vector.broadcast %16 : vector<128x1xf32> to vector<128x128xf32>
    %20 = arith.mulf %18, %19 : vector<128x128xf32>
    %21 = arith.truncf %20 : vector<128x128xf32> to vector<128x128xbf16>
    %c0_6 = arith.constant 0 : index
    %c0_7 = arith.constant 0 : index
    %22 = vector.load %arg2[%c0_6, %c0_7] : memref<128x128xbf16, #tpu.memory_space<vmem>>, vector<128x128xbf16>
    %cst_8 = arith.constant dense<0.000000e+00> : vector<128x128xf32>
    %23 = tpu.matmul %21, %22, %cst_8 {dimension_numbers = #tpu.dot_dimension_numbers<[1], [0], [0], [1], [0, 0, 1, 1], [], []>} : vector<128x128xbf16>, vector<128x128xbf16>, vector<128x128xf32> -> vector<128x128xf32>
    %c0_9 = arith.constant 0 : index
    %c0_10 = arith.constant 0 : index
    %24 = vector.load %arg3[%c0_9, %c0_10] : memref<1x128xf32, #tpu.memory_space<vmem>>, vector<1x128xf32>
    %25 = vector.broadcast %24 : vector<1x128xf32> to vector<128x128xf32>
    %26 = arith.addf %23, %25 : vector<128x128xf32>
    %cst_11 = arith.constant 0.000000e+00 : f32
    %27 = vector.broadcast %cst_11 : f32 to vector<128x128xf32>
    %28 = arith.maximumf %26, %27 : vector<128x128xf32>
    %29 = arith.truncf %28 : vector<128x128xf32> to vector<128x128xbf16>
    %c0_12 = arith.constant 0 : index
    %c0_13 = arith.constant 0 : index
    %30 = vector.load %arg4[%c0_12, %c0_13] : memref<128x128xbf16, #tpu.memory_space<vmem>>, vector<128x128xbf16>
    %cst_14 = arith.constant dense<0.000000e+00> : vector<128x128xf32>
    %31 = tpu.matmul %29, %30, %cst_14 {dimension_numbers = #tpu.dot_dimension_numbers<[1], [0], [0], [1], [0, 0, 1, 1], [], []>} : vector<128x128xbf16>, vector<128x128xbf16>, vector<128x128xf32> -> vector<128x128xf32>
    %c0_15 = arith.constant 0 : index
    %c0_16 = arith.constant 0 : index
    %32 = vector.load %arg5[%c0_15, %c0_16] : memref<1x128xf32, #tpu.memory_space<vmem>>, vector<1x128xf32>
    %33 = vector.broadcast %32 : vector<1x128xf32> to vector<128x128xf32>
    %34 = arith.addf %31, %33 : vector<128x128xf32>
    %35 = arith.addf %0, %34 : vector<128x128xf32>
    %c0_17 = arith.constant 0 : index
    %c0_18 = arith.constant 0 : index
    %36 = vector.load %arg6[%c0_17, %c0_18] : memref<128x128xf32, #tpu.memory_space<vmem>>, vector<128x128xf32>
    tpu.vector_store %arg6[%c0_17, %c0_18], %35 {strides = array<i32>} : memref<128x128xf32, #tpu.memory_space<vmem>>, vector<128x128xf32>,
    return
  }
  func.func @transform_0(%arg0: i32) -> (i32, i32) {
    %c0_i32 = arith.constant 0 : i32
    %c0_i32_0 = arith.constant 0 : i32
    return %arg0, %c0_i32 : i32, i32
  }
  func.func @transform_1(%arg0: i32) -> (i32, i32) {
    %c0_i32 = arith.constant 0 : i32
    %c0_i32_0 = arith.constant 0 : i32
    %c0_i32_1 = arith.constant 0 : i32
    return %c0_i32, %c0_i32_0 : i32, i32
  }
  func.func @transform_2(%arg0: i32) -> (i32, i32) {
    %c0_i32 = arith.constant 0 : i32
    %c0_i32_0 = arith.constant 0 : i32
    %c0_i32_1 = arith.constant 0 : i32
    return %c0_i32, %c0_i32_0 : i32, i32
  }
  func.func @transform_3(%arg0: i32) -> (i32, i32) {
    %c0_i32 = arith.constant 0 : i32
    %c0_i32_0 = arith.constant 0 : i32
    %c0_i32_1 = arith.constant 0 : i32
    return %c0_i32, %c0_i32_0 : i32, i32
  }
  func.func @transform_4(%arg0: i32) -> (i32, i32) {
    %c0_i32 = arith.constant 0 : i32
    %c0_i32_0 = arith.constant 0 : i32
    %c0_i32_1 = arith.constant 0 : i32
    return %c0_i32, %c0_i32_0 : i32, i32
  }
  func.func @transform_5(%arg0: i32) -> (i32, i32) {
    %c0_i32 = arith.constant 0 : i32
    %c0_i32_0 = arith.constant 0 : i32
    return %arg0, %c0_i32 : i32, i32
  }
}

</mosaic_0001>

<bundles_post_ra>
// kernel: feature_mixer_layer.1
= control target key start
LH: loop header
LB: loop body
LE: loop exit
PB: predicated region body
PF: predicated region fallthrough
CT: control target
= control target key end

     0   :  { %s1181_s0 = inlined_call_operand.vmem [shape: f32[128,128], index: 0, kind: input, shape index: {}]   ;;  %s1182_s1 = inlined_call_operand.vmem [shape: bf16[128,128], index: 1, kind: input, shape index: {}]   ;;  %s1183_s2 = inlined_call_operand.vmem [shape: f32[1,128], index: 2, kind: input, shape index: {}]   ;;  %s1184_s3 = inlined_call_operand.vmem [shape: bf16[128,128], index: 3, kind: input, shape index: {}]   ;;  %s1185_s4 = inlined_call_operand.vmem [shape: f32[1,128], index: 4, kind: input, shape index: {}]   ;;  %s1186_s5 = inlined_call_operand.hbm [shape: f32[128,128], index: 5, kind: output, shape index: {}]  }
   0x1   :  { %v903_v0 = vld [vmem:[%s1181_s0 + $0x10] sm:$0xff]  ;;  %v908_v1 = vld [vmem:[%s1181_s0] sm:$0xff]  ;;  %v915_v2 = vld [vmem:[%s1181_s0 + $0x18] sm:$0xff] }
   0x2   :  { %42 = vadd.xlane.f32.xlu1 %v903_v0  ;;  %38 = vadd.xlane.f32.xlu0 %v908_v1  ;;  %v920_v3 = vld [vmem:[%s1181_s0 + $0x8] sm:$0xff]  ;;  %v86_v5 = vmul.f32 %v908_v1, %v908_v1  ;;  %v89_v6 = vmul.f32 %v915_v2, %v915_v2  ;;  %v88_v7 = vmul.f32 %v903_v0, %v903_v0  ;;  %v940_v9 = vld [vmem:[%s1181_s0 + $0x20] sm:$0xff] }
   0x3   :  { %v87_v4 = vmul.f32 %v920_v3, %v920_v3  ;;  %v935_v8 = vld [vmem:[%s1181_s0 + $0x28] sm:$0xff]  ;;  %v795_v10 = vld [vmem:[%s1182_s1] sm:$0xff]  }
   0x6   :  { %44 = vadd.xlane.f32.xlu1 %v915_v2  ;;  %40 = vadd.xlane.f32.xlu0 %v920_v3 }
   0xa   :  { %104 = vadd.xlane.f32.xlu1 %v87_v4  ;;  %102 = vadd.xlane.f32.xlu0 %v86_v5 }
   0xe   :  { %108 = vadd.xlane.f32.xlu1 %v89_v6  ;;  %106 = vadd.xlane.f32.xlu0 %v88_v7 }
   0xf   :  { %10 = vsyncpa [#allocation3], 0  ;;  %v950_v11 = vld [vmem:[%s1181_s0 + $0x38] sm:$0xff]  ;;  %v955_v12 = vld [vmem:[%s1181_s0 + $0x30] sm:$0xff]  ;;  %728 = vmatprep.subr.bf16.mxu0 %v795_v10  ;;  %v91_v14 = vmul.f32 %v935_v8, %v935_v8  ;;  %v90_v15 = vmul.f32 %v940_v9, %v940_v9 }
  0x10   :  { %729 = vmatpush3.bf16.msra.mxu0 %v795_v10  ;;  %v796_v13 = vld [vmem:[%s1182_s1 + $0x8] sm:$0xff]   ;;  %v93_v16 = vmul.f32 %v950_v11, %v950_v11  ;;  %v92_v17 = vmul.f32 %v955_v12, %v955_v12  ;;  %v797_v18 = vld [vmem:[%s1182_s1 + $0x10] sm:$0xff]   ;;  %v798_v19 = vld [vmem:[%s1182_s1 + $0x18] sm:$0xff]  }
  0x11   :  { %730 = vmatprep.subr.bf16.mxu0 %v796_v13  ;;  %v979_v20 = vld [vmem:[%s1181_s0 + $0x48] sm:$0xff]  ;;  %v984_v21 = vld [vmem:[%s1181_s0 + $0x40] sm:$0xff]  ;;  %v994_v23 = vld [vmem:[%s1181_s0 + $0x58] sm:$0xff] }
  0x12   :  { %48 = vadd.xlane.f32.xlu1 %v935_v8  ;;  %46 = vadd.xlane.f32.xlu0 %v940_v9  ;;  %v799_v22 = vld [vmem:[%s1182_s1 + $0x20] sm:$0xff]   ;;  %v999_v24 = vld [vmem:[%s1181_s0 + $0x50] sm:$0xff]  ;;  %v95_v25 = vmul.f32 %v979_v20, %v979_v20  ;;  %v94_v26 = vmul.f32 %v984_v21, %v984_v21  ;;  %v800_v27 = vld [vmem:[%s1182_s1 + $0x28] sm:$0xff]   ;;  %v97_v28 = vmul.f32 %v994_v23, %v994_v23 }
  0x13   :  { %v96_v29 = vmul.f32 %v999_v24, %v999_v24  ;;  %v801_v30 = vld [vmem:[%s1182_s1 + $0x30] sm:$0xff]   ;;  %v802_v31 = vld [vmem:[%s1182_s1 + $0x38] sm:$0xff]   ;;  %v1023_v32 = vld [vmem:[%s1181_s0 + $0x68] sm:$0xff] }
  0x14   :  { %731 = vmatpush3.bf16.msra.mxu0 %v796_v13  ;;  %v1028_v33 = vld [vmem:[%s1181_s0 + $0x60] sm:$0xff]  ;;  %v1035_v34 = vld [vmem:[%s1181_s0 + $0x78] sm:$0xff]  ;;  %v1040_v35 = vld [vmem:[%s1181_s0 + $0x70] sm:$0xff]  ;;  %v99_v36 = vmul.f32 %v1023_v32, %v1023_v32 }
  0x15   :  { %732 = vmatprep.subr.bf16.mxu0 %v797_v18  ;;  %v98_v37 = vmul.f32 %v1028_v33, %v1028_v33  ;;  %v101_v38 = vmul.f32 %v1035_v34, %v1035_v34  ;;  %v100_v39 = vmul.f32 %v1040_v35, %v1040_v35  ;;  %v803_v40 = vld [vmem:[%s1184_s3] sm:$0xff]   ;;  %v804_v41 = vld [vmem:[%s1184_s3 + $0x8] sm:$0xff]   ;;  %v805_v42 = vld [vmem:[%s1184_s3 + $0x10] sm:$0xff]  }
  0x16   :  { %52 = vadd.xlane.f32.xlu1 %v950_v11  ;;  %50 = vadd.xlane.f32.xlu0 %v955_v12  ;;  %v806_v43 = vld [vmem:[%s1184_s3 + $0x18] sm:$0xff]   ;;  %v807_v44 = vld [vmem:[%s1184_s3 + $0x20] sm:$0xff]   ;;  %v808_v45 = vld [vmem:[%s1184_s3 + $0x28] sm:$0xff]  }
  0x17   :  { %760 = vmatprep.subr.bf16.mxu1 %v803_v40 }
  0x18   :  { %733 = vmatpush3.bf16.msra.mxu0 %v797_v18  ;;  %761 = vmatpush3.bf16.msra.mxu1 %v803_v40 }
  0x19   :  { %734 = vmatprep.subr.bf16.mxu0 %v798_v19  ;;  %762 = vmatprep.subr.bf16.mxu1 %v804_v41 }
  0x1a   :  { %112 = vadd.xlane.f32.xlu1 %v91_v14  ;;  %110 = vadd.xlane.f32.xlu0 %v90_v15 }
  0x1c   :  { %735 = vmatpush3.bf16.msra.mxu0 %v798_v19  ;;  %763 = vmatpush3.bf16.msra.mxu1 %v804_v41 }
  0x1d   :  { %736 = vmatprep.subr.bf16.mxu0 %v799_v22  ;;  %764 = vmatprep.subr.bf16.mxu1 %v805_v42 }
  0x1e   :  { %116 = vadd.xlane.f32.xlu1 %v93_v16  ;;  %114 = vadd.xlane.f32.xlu0 %v92_v17 }
  0x20   :  { %737 = vmatpush3.bf16.msra.mxu0 %v799_v22  ;;  %765 = vmatpush3.bf16.msra.mxu1 %v805_v42 }
  0x21   :  { %738 = vmatprep.subr.bf16.mxu0 %v800_v27  ;;  %766 = vmatprep.subr.bf16.mxu1 %v806_v43 }
  0x22   :  { %56 = vadd.xlane.f32.xlu1 %v979_v20  ;;  %54 = vadd.xlane.f32.xlu0 %v984_v21 }
  0x24   :  { %739 = vmatpush3.bf16.msra.mxu0 %v800_v27  ;;  %767 = vmatpush3.bf16.msra.mxu1 %v806_v43 }
  0x25   :  { %740 = vmatprep.subr.bf16.mxu0 %v801_v30  ;;  %768 = vmatprep.subr.bf16.mxu1 %v807_v44 }
  0x26   :  { %60 = vadd.xlane.f32.xlu1 %v994_v23  ;;  %58 = vadd.xlane.f32.xlu0 %v999_v24 }
  0x28   :  { %741 = vmatpush3.bf16.msra.mxu0 %v801_v30  ;;  %769 = vmatpush3.bf16.msra.mxu1 %v807_v44 }
  0x29   :  { %742 = vmatprep.subr.bf16.mxu0 %v802_v31  ;;  %770 = vmatprep.subr.bf16.mxu1 %v808_v45 }
  0x2a   :  { %120 = vadd.xlane.f32.xlu1 %v95_v25  ;;  %118 = vadd.xlane.f32.xlu0 %v94_v26 }
  0x2c   :  { %743 = vmatpush3.bf16.msra.mxu0 %v802_v31  ;;  %771 = vmatpush3.bf16.msra.mxu1 %v808_v45 }
  0x2e   :  { %124 = vadd.xlane.f32.xlu1 %v97_v28  ;;  %122 = vadd.xlane.f32.xlu0 %v96_v29 }
  0x32   :  { %64 = vadd.xlane.f32.xlu1 %v1023_v32  ;;  %62 = vadd.xlane.f32.xlu0 %v1028_v33 }
  0x36   :  { %68 = vadd.xlane.f32.xlu1 %v1035_v34  ;;  %66 = vadd.xlane.f32.xlu0 %v1040_v35 }
  0x3a   :  { %128 = vadd.xlane.f32.xlu1 %v99_v36  ;;  %126 = vadd.xlane.f32.xlu0 %v98_v37 }
  0x3e   :  { %132 = vadd.xlane.f32.xlu1 %v101_v38  ;;  %130 = vadd.xlane.f32.xlu0 %v100_v39 }
  0x8f   :  { %v43_v46 = vpop.xlane.xlu1 %42  ;;  %v39_v47 = vpop.xlane.xlu0 %38 }
  0x90   :  { %v1070_v50 = vmul.f32 0.0078125, %v39_v47  ;;  %v1072_v52 = vmul.f32 0.0078125, %v43_v46 }
  0x92   :  { %v150_v56 = vmul.f32 %v1070_v50, %v1070_v50  ;;  %v152_v62 = vmul.f32 %v1072_v52, %v1072_v52 }
  0x93   :  { %v45_v48 = vpop.xlane.xlu1 %44  ;;  %v41_v49 = vpop.xlane.xlu0 %40 }
  0x94   :  { %v71_v51 = vmul.f32 0.0078125, %v41_v49  ;;  %v1074_v53 = vmul.f32 0.0078125, %v45_v48  ;;  %v230_v49 = vsub.f32 %v908_v1, %v1070_v50 }
  0x96   :  { %v151_v57 = vmul.f32 %v71_v51, %v71_v51  ;;  %v153_v63 = vmul.f32 %v1074_v53, %v1074_v53  ;;  %v231_v44 = vsub.f32 %v920_v3, %v71_v51 }
  0x97   :  { %v105_v54 = vpop.xlane.xlu1 %104  ;;  %v103_v55 = vpop.xlane.xlu0 %102 }
  0x98   :  { %v135_v58 = vmul.f32 0.0078125, %v105_v54  ;;  %v134_v59 = vmul.f32 0.0078125, %v103_v55 }
  0x9a   :  { %v167_v60 = vsub.f32 %v135_v58, %v151_v57  ;;  %v166_v61 = vsub.f32 %v134_v59, %v150_v56 }
  0x9b   :  { %v109_v4 = vpop.xlane.xlu1 %108  ;;  %v107_v5 = vpop.xlane.xlu0 %106 }
  0x9c   :  { %v183_v6 = vmax.f32 %v167_v60, 0.0  ;;  %v182_v7 = vmax.f32 %v166_v61, 0.0  ;;  %v137_v10 = vmul.f32 0.0078125, %v109_v4  ;;  %v136_v13 = vmul.f32 0.0078125, %v107_v5 }
  0x9e   :  { %v199_v14 = vadd.f32 1e-05, %v183_v6  ;;  %v198_v15 = vadd.f32 1e-05, %v182_v7  ;;  %v169_v16 = vsub.f32 %v137_v10, %v153_v63  ;;  %v168_v17 = vsub.f32 %v136_v13, %v152_v62 }
  0x9f   :  { %v49_v18 = vpop.xlane.xlu1 %48  ;;  %v47_v19 = vpop.xlane.xlu0 %46  ;;  %v233_v62 = vsub.f32 %v915_v2, %v1074_v53  ;;  %v232_v13 = vsub.f32 %v903_v0, %v1072_v52 }
  0xa0   :  { %811 = vrsqrt.f32 %v199_v14  ;;  %v185_v22 = vmax.f32 %v169_v16, 0.0  ;;  %v184_v25 = vmax.f32 %v168_v17, 0.0  ;;  %v1082_v30 = vmul.f32 0.0078125, %v49_v18 }
  0xa1   :  { %813 = vrsqrt.f32 %v198_v15  ;;  %v1084_v31 = vmul.f32 0.0078125, %v47_v19 }
  0xa2   :  { %v201_v26 = vadd.f32 1e-05, %v185_v22  ;;  %v200_v27 = vadd.f32 1e-05, %v184_v25  ;;  %v155_v40 = vmul.f32 %v1082_v30, %v1082_v30 }
  0xa3   :  { %v53_v28 = vpop.xlane.xlu1 %52  ;;  %v51_v29 = vpop.xlane.xlu0 %50  ;;  %v154_v41 = vmul.f32 %v1084_v31, %v1084_v31 }
  0xa4   :  { %815 = vrsqrt.f32 %v201_v26  ;;  %v1086_v36 = vmul.f32 0.0078125, %v53_v28  ;;  %v1088_v37 = vmul.f32 0.0078125, %v51_v29 }
  0xa5   :  { %817 = vrsqrt.f32 %v200_v27 }
  0xa6   :  { %v157_v54 = vmul.f32 %v1086_v36, %v1086_v36  ;;  %v156_v55 = vmul.f32 %v1088_v37, %v1088_v37 }
  0xa7   :  { %v113_v38 = vpop.xlane.xlu1 %112  ;;  %v111_v39 = vpop.xlane.xlu0 %110 }
  0xa8   :  { %v139_v42 = vmul.f32 0.0078125, %v113_v38  ;;  %v138_v43 = vmul.f32 0.0078125, %v111_v39 }
  0xaa   :  { %v812_v45 = vpop.eup %811  ;;  %v171_v46 = vsub.f32 %v139_v42, %v155_v40  ;;  %v170_v47 = vsub.f32 %v138_v43, %v154_v41 }
  0xab   :  { %v814_v48 = vpop.eup %813  ;;  %v117_v56 = vpop.xlane.xlu1 %116  ;;  %v247_v58 = vmul.f32 %v812_v45, %v231_v44 }
  0xac   :  { %v115_v57 = vpop.xlane.xlu0 %114  ;;  %v187_v59 = vmax.f32 %v171_v46, 0.0  ;;  %v186_v60 = vmax.f32 %v170_v47, 0.0  ;;  %v141_v61 = vmul.f32 0.0078125, %v117_v56  ;;  %v246_v63 = vmul.f32 %v814_v48, %v230_v49 }
  0xad   :  { %v140_v51 = vmul.f32 0.0078125, %v115_v57  ;;  %v235_v46 = vsub.f32 %v935_v8, %v1082_v30 }
  0xae   :  { %v816_v4 = vpop.eup %815  ;;  %v203_v5 = vadd.f32 1e-05, %v187_v59  ;;  %v202_v50 = vadd.f32 1e-05, %v186_v60  ;;  %v173_v6 = vsub.f32 %v141_v61, %v157_v54  ;;  %v262_v15 = vpack.c.bf16 %v247_v58, %v246_v63 }
  0xaf   :  { %v172_v7 = vsub.f32 %v140_v51, %v156_v55  ;;  %v818_v10 = vpop.eup %817  ;;  %v57_v14 = vpop.xlane.xlu1 %56  ;;  %v249_v17 = vmul.f32 %v816_v4, %v233_v62  ;;  %v234_v55 = vsub.f32 %v940_v9, %v1084_v31  ;;  %v237_v63 = vsub.f32 %v950_v11, %v1086_v36 }
  0xb0   :  { %v55_v16 = vpop.xlane.xlu0 %54  ;;  %819 = vrsqrt.f32 %v203_v5  ;;  %v189_v18 = vmax.f32 %v173_v6, 0.0  ;;  %744 = vmatprep.mubr.bf16.mxu0 %v262_v15  ;;  %v248_v53 = vmul.f32 %v818_v10, %v232_v13  ;;  %v1105_v29 = vmul.f32 0.0078125, %v57_v14 }
  0xb1   :  { %v188_v19 = vmax.f32 %v172_v7, 0.0  ;;  %821 = vrsqrt.f32 %v202_v50  ;;  %v1107_v38 = vmul.f32 0.0078125, %v55_v16  ;;  %v236_v13 = vsub.f32 %v955_v12, %v1088_v37 }
  0xb2   :  { %v205_v22 = vadd.f32 1e-05, %v189_v18  ;;  %v263_v27 = vpack.c.bf16 %v249_v17, %v248_v53  ;;  %v159_v42 = vmul.f32 %v1105_v29, %v1105_v29 }
  0xb3   :  { %v204_v25 = vadd.f32 1e-05, %v188_v19  ;;  %v61_v26 = vpop.xlane.xlu1 %60  ;;  %v158_v43 = vmul.f32 %v1107_v38, %v1107_v38 }
  0xb4   :  { %v59_v28 = vpop.xlane.xlu0 %58  ;;  %823 = vrsqrt.f32 %v205_v22  ;;  %745 = vmatmul.mubr.bf16.vlgmr.msra.gmra.mrb[0].mxu0 %v263_v27  ;;  %v1109_v52 = vmul.f32 0.0078125, %v61_v26 }
  0xb5   :  { %825 = vrsqrt.f32 %v204_v25  ;;  %v1111_v39 = vmul.f32 0.0078125, %v59_v28 }
  0xb6   :  { %v161_v56 = vmul.f32 %v1109_v52, %v1109_v52 }
  0xb7   :  { %v121_v40 = vpop.xlane.xlu1 %120  ;;  %v160_v57 = vmul.f32 %v1111_v39, %v1111_v39 }
  0xb8   :  { %v119_v41 = vpop.xlane.xlu0 %118  ;;  %v143_v44 = vmul.f32 0.0078125, %v121_v40 }
  0xb9   :  { %v142_v45 = vmul.f32 0.0078125, %v119_v41 }
  0xba   :  { %v820_v47 = vpop.eup %819  ;;  %v175_v48 = vsub.f32 %v143_v44, %v159_v42 }
  0xbb   :  { %v174_v49 = vsub.f32 %v142_v45, %v158_v43  ;;  %v822_v54 = vpop.eup %821  ;;  %v125_v58 = vpop.xlane.xlu1 %124  ;;  %v251_v60 = vmul.f32 %v820_v47, %v235_v46 }
  0xbc   :  { %v123_v59 = vpop.xlane.xlu0 %122  ;;  %v191_v61 = vmax.f32 %v175_v48, 0.0  ;;  %v145_v62 = vmul.f32 0.0078125, %v125_v58  ;;  %v250_v4 = vmul.f32 %v822_v54, %v234_v55  ;;  %v239_v48 = vsub.f32 %v979_v20, %v1105_v29 }
  0xbd   :  { %v190_v51 = vmax.f32 %v174_v49, 0.0  ;;  %v144_v30 = vmul.f32 0.0078125, %v123_v59  ;;  %v240_v29 = vsub.f32 %v999_v24, %v1111_v39 }
  0xbe   :  { %v824_v5 = vpop.eup %823  ;;  %v207_v50 = vadd.f32 1e-05, %v191_v61  ;;  %v177_v6 = vsub.f32 %v145_v62, %v161_v56  ;;  %v264_v15 = vpack.c.bf16 %v251_v60, %v250_v4 }
  0xbf   :  { %v206_v31 = vadd.f32 1e-05, %v190_v51  ;;  %v176_v7 = vsub.f32 %v144_v30, %v160_v57  ;;  %v826_v10 = vpop.eup %825  ;;  %v65_v14 = vpop.xlane.xlu1 %64  ;;  %v253_v17 = vmul.f32 %v824_v5, %v237_v63  ;;  %v238_v57 = vsub.f32 %v984_v21, %v1107_v38 }
  0xc0   :  { %v63_v16 = vpop.xlane.xlu0 %62  ;;  %827 = vrsqrt.f32 %v207_v50  ;;  %v193_v18 = vmax.f32 %v177_v6, 0.0  ;;  %748 = vmatprep.mubr.bf16.mxu0 %v264_v15  ;;  %v252_v36 = vmul.f32 %v826_v10, %v236_v13  ;;  %v83_v28 = vmul.f32 0.0078125, %v65_v14 }
  0xc1   :  { %v192_v19 = vmax.f32 %v176_v7, 0.0  ;;  %829 = vrsqrt.f32 %v206_v31  ;;  %v82_v40 = vmul.f32 0.0078125, %v63_v16  ;;  %v241_v5 = vsub.f32 %v994_v23, %v1109_v52 }
  0xc2   :  { %v209_v53 = vadd.f32 1e-05, %v193_v18  ;;  %v265_v26 = vpack.c.bf16 %v253_v17, %v252_v36  ;;  %v163_v44 = vmul.f32 %v83_v28, %v83_v28  ;;  %v243_v39 = vsub.f32 %v1023_v32, %v83_v28  ;;  %v809_v28 = vld [vmem:[%s1184_s3 + $0x30] sm:$0xff]  }
  0xc3   :  { %v208_v22 = vadd.f32 1e-05, %v192_v19  ;;  %v69_v25 = vpop.xlane.xlu1 %68  ;;  %v162_v45 = vmul.f32 %v82_v40, %v82_v40  ;;  %772 = vmatprep.subr.bf16.mxu1 %v809_v28 }
  0xc4   :  { %v67_v27 = vpop.xlane.xlu0 %66  ;;  %831 = vrsqrt.f32 %v209_v53  ;;  %749 = vmatmul.mubr.bf16.gmra.mrb[4].mxu0 %v265_v26  ;;  %v85_v37 = vmul.f32 0.0078125, %v69_v25  ;;  %773 = vmatpush3.bf16.msra.mxu1 %v809_v28 }
  0xc5   :  { %833 = vrsqrt.f32 %v208_v22  ;;  %v84_v41 = vmul.f32 0.0078125, %v67_v27  ;;  %v242_v22 = vsub.f32 %v1028_v33, %v82_v40  ;;  %v810_v40 = vld [vmem:[%s1184_s3 + $0x38] sm:$0xff]  }
  0xc6   :  { %v165_v58 = vmul.f32 %v85_v37, %v85_v37  ;;  %774 = vmatprep.subr.bf16.mxu1 %v810_v40 }
  0xc7   :  { %v129_v42 = vpop.xlane.xlu1 %128  ;;  %v164_v59 = vmul.f32 %v84_v41, %v84_v41 }
  0xc8   :  { %v127_v43 = vpop.xlane.xlu0 %126  ;;  %v147_v46 = vmul.f32 0.0078125, %v129_v42  ;;  %v245_v42 = vsub.f32 %v1035_v34, %v85_v37  ;;  %775 = vmatpush3.bf16.msra.mxu1 %v810_v40  ;;  %v678_v37 = vld [vmem:[%s1183_s2] ss:$0 sm:$0xff] }
  0xc9   :  { %v146_v47 = vmul.f32 0.0078125, %v127_v43 }
  0xca   :  { %v828_v49 = vpop.eup %827  ;;  %v179_v54 = vsub.f32 %v147_v46, %v163_v44  ;;  %v244_v44 = vsub.f32 %v1040_v35, %v84_v41 }
  0xcb   :  { %v178_v55 = vsub.f32 %v146_v47, %v162_v45  ;;  %v830_v56 = vpop.eup %829  ;;  %v133_v60 = vpop.xlane.xlu1 %132  ;;  %v255_v51 = vmul.f32 %v828_v49, %v239_v48 }
  0xcc   :  { %v131_v61 = vpop.xlane.xlu0 %130  ;;  %v195_v62 = vmax.f32 %v179_v54, 0.0  ;;  %v149_v63 = vmul.f32 0.0078125, %v133_v60  ;;  %v254_v50 = vmul.f32 %v830_v56, %v238_v57 }
  0xcd   :  { %v194_v30 = vmax.f32 %v178_v55, 0.0  ;;  %v148_v4 = vmul.f32 0.0078125, %v131_v61 }
  0xce   :  { %v832_v31 = vpop.eup %831  ;;  %v211_v6 = vadd.f32 1e-05, %v195_v62  ;;  %v181_v38 = vsub.f32 %v149_v63, %v165_v58  ;;  %v266_v14 = vpack.c.bf16 %v255_v51, %v254_v50 }
  0xcf   :  { %v210_v7 = vadd.f32 1e-05, %v194_v30  ;;  %v180_v10 = vsub.f32 %v148_v4, %v164_v59  ;;  %v834_v13 = vpop.eup %833  ;;  %v257_v15 = vmul.f32 %v832_v31, %v241_v5 }
  0xd0   :  { %835 = vrsqrt.f32 %v211_v6  ;;  %v197_v16 = vmax.f32 %v181_v38, 0.0  ;;  %v256_v18 = vmul.f32 %v834_v13, %v240_v29  ;;  %752 = vmatprep.mubr.bf16.mxu0 %v266_v14 }
  0xd1   :  { %v196_v17 = vmax.f32 %v180_v10, 0.0  ;;  %837 = vrsqrt.f32 %v210_v7 }
  0xd2   :  { %v213_v19 = vadd.f32 1e-05, %v197_v16  ;;  %v267_v36 = vpack.c.bf16 %v257_v15, %v256_v18 }
  0xd3   :  { %v212_v52 = vadd.f32 1e-05, %v196_v17 }
  0xd4   :  { %839 = vrsqrt.f32 %v213_v19  ;;  %753 = vmatmul.mubr.bf16.gmra.mrb[8].mxu0 %v267_v36 }
  0xd5   :  { %841 = vrsqrt.f32 %v212_v52 }
  0xda   :  { %v836_v53 = vpop.eup %835 }
  0xdb   :  { %v838_v25 = vpop.eup %837  ;;  %v259_v26 = vmul.f32 %v836_v53, %v243_v39 }
  0xdc   :  { %v258_v27 = vmul.f32 %v838_v25, %v242_v22 }
  0xde   :  { %v840_v43 = vpop.eup %839  ;;  %v268_v45 = vpack.c.bf16 %v259_v26, %v258_v27 }
  0xdf   :  { %v842_v46 = vpop.eup %841  ;;  %v261_v47 = vmul.f32 %v840_v43, %v245_v42 }
  0xe0   :  { %756 = vmatprep.mubr.bf16.mxu0 %v268_v45  ;;  %v260_v48 = vmul.f32 %v842_v46, %v244_v44 }
  0xe2   :  { %v269_v49 = vpack.c.bf16 %v261_v47, %v260_v48 }
  0xe4   :  { %757 = vmatmul.mubr.bf16.gmra.mrb[12].mxu0 %v269_v49 }
 0x187   :  { %v746_v41 = vpop.f32.mrb[0].mxu0 }
 0x188   :  { %v384_v54 = vadd.f32 %v746_v41, %v678_v37  ;;  %v375_v55 = vpop.f32.mrb[1].mxu0 }
 0x189   :  { %v376_v56 = vadd.f32 %v678_v37, %v375_v55  ;;  %v747_v57 = vpop.f32.mrb[2].mxu0 }
 0x18a   :  { %v387_v58 = vadd.f32 %v747_v57, %v678_v37  ;;  %v378_v59 = vpop.f32.mrb[3].mxu0  ;;  %v440_v61 = vmax.f32 %v384_v54, 0.0 }
 0x18b   :  { %v379_v60 = vadd.f32 %v678_v37, %v378_v59  ;;  %v438_v62 = vmax.f32 %v376_v56, 0.0 }
 0x18c   :  { %v441_v51 = vmax.f32 %v387_v58, 0.0 }
 0x18d   :  { %v439_v30 = vmax.f32 %v379_v60, 0.0 }
 0x18e   :  { %v455_v63 = vpack.c.bf16 %v441_v51, %v440_v61  ;;  %v687_v51 = vld [vmem:[%s1185_s4] ss:$0 sm:$0xff]  ;;  %s867_s4 = smov [#allocation2]  }
 0x18f   :  { %v454_v4 = vpack.c.bf16 %v439_v30, %v438_v62  ;;  %s667_s7 = sshll.u32 %s867_s4, 4  ;;  %s668_s7 = int_to_ptr.vmem [resolvable:$true] %s667_s7 }
 0x190   :  { %s843_s8 = scalar_lea.vmem %s668_s7, 2048  ;;  %p848_p1 = scmp.lt.s32.totalorder %s668_s7, %s668_s7 }
 0x191   :  { %776 = vmatprep.mubr.bf16.mxu1 %v454_v4  ;;  %p844_p0 = scmp.ne.s32.totalorder %s668_s7, %s843_s8  ;;  %p849_p2 = scmp.lt.s32.totalorder %s843_s8, %s843_s8 }
 0x192   :  { %777 = vmatmul.mubr.bf16.vlgmr.msra.gmra.mrb[0].mxu1 %v455_v63 }
 0x193   :  { %p850_p3 = por %p849_p2, %p848_p1 }
 0x195   :  { %p851_p4 = pnand %p850_p3, %p844_p0 }
 0x197   :  { %v750_v5 = vpop.f32.mrb[4].mxu0 }
 0x198   :  { %v400_v29 = vadd.f32 %v750_v5, %v678_v37  ;;  %v391_v50 = vpop.f32.mrb[5].mxu0 }
 0x199   :  { %v392_v31 = vadd.f32 %v678_v37, %v391_v50  ;;  %v751_v6 = vpop.f32.mrb[6].mxu0 }
 0x19a   :  { %v403_v7 = vadd.f32 %v751_v6, %v678_v37  ;;  %v394_v38 = vpop.f32.mrb[7].mxu0  ;;  %v444_v13 = vmax.f32 %v400_v29, 0.0 }
 0x19b   :  { %v395_v10 = vadd.f32 %v678_v37, %v394_v38  ;;  %v442_v15 = vmax.f32 %v392_v31, 0.0 }
 0x19c   :  { %v445_v14 = vmax.f32 %v403_v7, 0.0 }
 0x19d   :  { %v443_v16 = vmax.f32 %v395_v10, 0.0 }
 0x19e   :  { %v457_v17 = vpack.c.bf16 %v445_v14, %v444_v13 }
 0x19f   :  { %v456_v18 = vpack.c.bf16 %v443_v16, %v442_v15 }
 0x1a1   :  { %780 = vmatprep.mubr.bf16.mxu1 %v456_v18 }
 0x1a2   :  { %781 = vmatmul.mubr.bf16.gmra.mrb[4].mxu1 %v457_v17 }
 0x1a7   :  { %v754_v19 = vpop.f32.mrb[8].mxu0 }
 0x1a8   :  { %v416_v52 = vadd.f32 %v754_v19, %v678_v37  ;;  %v407_v36 = vpop.f32.mrb[9].mxu0 }
 0x1a9   :  { %v408_v39 = vadd.f32 %v678_v37, %v407_v36  ;;  %v755_v53 = vpop.f32.mrb[10].mxu0 }
 0x1aa   :  { %v419_v22 = vadd.f32 %v755_v53, %v678_v37  ;;  %v410_v25 = vpop.f32.mrb[11].mxu0  ;;  %v448_v27 = vmax.f32 %v416_v52, 0.0 }
 0x1ab   :  { %v411_v26 = vadd.f32 %v678_v37, %v410_v25  ;;  %v446_v43 = vmax.f32 %v408_v39, 0.0 }
 0x1ac   :  { %v449_v42 = vmax.f32 %v419_v22, 0.0 }
 0x1ad   :  { %v447_v44 = vmax.f32 %v411_v26, 0.0 }
 0x1ae   :  { %v459_v45 = vpack.c.bf16 %v449_v42, %v448_v27 }
 0x1af   :  { %v458_v46 = vpack.c.bf16 %v447_v44, %v446_v43 }
 0x1b1   :  { %784 = vmatprep.mubr.bf16.mxu1 %v458_v46 }
 0x1b2   :  { %785 = vmatmul.mubr.bf16.gmra.mrb[8].mxu1 %v459_v45 }
 0x1b7   :  { %v758_v47 = vpop.f32.mrb[12].mxu0 }
 0x1b8   :  { %v432_v48 = vadd.f32 %v758_v47, %v678_v37  ;;  %v423_v49 = vpop.f32.mrb[13].mxu0 }
 0x1b9   :  { %v424_v28 = vadd.f32 %v678_v37, %v423_v49  ;;  %v759_v40 = vpop.f32.mrb[14].mxu0 }
 0x1ba   :  { %v435_v41 = vadd.f32 %v759_v40, %v678_v37  ;;  %v426_v54 = vpop.f32.mrb[15].mxu0  ;;  %v452_v56 = vmax.f32 %v432_v48, 0.0 }
 0x1bb   :  { %v427_v55 = vadd.f32 %v678_v37, %v426_v54  ;;  %v450_v58 = vmax.f32 %v424_v28, 0.0 }
 0x1bc   :  { %v453_v57 = vmax.f32 %v435_v41, 0.0 }
 0x1bd   :  { %v451_v59 = vmax.f32 %v427_v55, 0.0 }
 0x1be   :  { %v461_v60 = vpack.c.bf16 %v453_v57, %v452_v56 }
 0x1bf   :  { %v460_v61 = vpack.c.bf16 %v451_v59, %v450_v58 }
 0x1c1   :  { %788 = vmatprep.mubr.bf16.mxu1 %v460_v61 }
 0x1c2   :  { %789 = vmatmul.mubr.bf16.gmra.mrb[12].mxu1 %v461_v60 }
 0x265   :  { %v778_v62 = vpop.f32.mrb[0].mxu1 }
 0x266   :  { %v576_v30 = vadd.f32 %v778_v62, %v687_v51  ;;  %v567_v63 = vpop.f32.mrb[1].mxu1 }
 0x267   :  { %v568_v4 = vadd.f32 %v687_v51, %v567_v63  ;;  %v779_v5 = vpop.f32.mrb[2].mxu1 }
 0x268   :  { %v632_v29 = vadd.f32 %v576_v30, %v903_v0  ;;  %v579_v37 = vadd.f32 %v779_v5, %v687_v51  ;;  %v570_v50 = vpop.f32.mrb[3].mxu1 }
 0x269   :  { %v630_v31 = vadd.f32 %v568_v4, %v908_v1  ;;  %v571_v6 = vadd.f32 %v687_v51, %v570_v50 }
 0x26a   :  { %648 = vst [vmem:[#allocation2 + $0x10] sm:$0xff] %v632_v29  ;;  %v633_v7 = vadd.f32 %v579_v37, %v915_v2 }
 0x26b   :  { %646 = vst [vmem:[#allocation2] sm:$0xff] %v630_v31  ;;  %v631_v38 = vadd.f32 %v571_v6, %v920_v3 }
 0x26c   :  { %649 = vst [vmem:[#allocation2 + $0x18] sm:$0xff] %v633_v7 }
 0x26d   :  { %647 = vst [vmem:[#allocation2 + $0x8] sm:$0xff] %v631_v38 }
 0x275   :  { %v782_v10 = vpop.f32.mrb[4].mxu1 }
 0x276   :  { %v592_v13 = vadd.f32 %v782_v10, %v687_v51  ;;  %v583_v14 = vpop.f32.mrb[5].mxu1 }
 0x277   :  { %v584_v15 = vadd.f32 %v687_v51, %v583_v14  ;;  %v783_v16 = vpop.f32.mrb[6].mxu1 }
 0x278   :  { %v636_v0 = vadd.f32 %v592_v13, %v955_v12  ;;  %v595_v17 = vadd.f32 %v783_v16, %v687_v51  ;;  %v586_v18 = vpop.f32.mrb[7].mxu1 }
 0x279   :  { %v634_v1 = vadd.f32 %v584_v15, %v940_v9  ;;  %v587_v19 = vadd.f32 %v687_v51, %v586_v18 }
 0x27a   :  { %652 = vst [vmem:[#allocation2 + $0x30] sm:$0xff] %v636_v0  ;;  %v637_v2 = vadd.f32 %v595_v17, %v950_v11 }
 0x27b   :  { %650 = vst [vmem:[#allocation2 + $0x20] sm:$0xff] %v634_v1  ;;  %v635_v3 = vadd.f32 %v587_v19, %v935_v8 }
 0x27c   :  { %653 = vst [vmem:[#allocation2 + $0x38] sm:$0xff] %v637_v2 }
 0x27d   :  { %651 = vst [vmem:[#allocation2 + $0x28] sm:$0xff] %v635_v3 }
 0x285   :  { %v786_v52 = vpop.f32.mrb[8].mxu1 }
 0x286   :  { %v608_v36 = vadd.f32 %v786_v52, %v687_v51  ;;  %v599_v39 = vpop.f32.mrb[9].mxu1 }
 0x287   :  { %v600_v53 = vadd.f32 %v687_v51, %v599_v39  ;;  %v787_v22 = vpop.f32.mrb[10].mxu1 }
 0x288   :  { %v640_v12 = vadd.f32 %v608_v36, %v999_v24  ;;  %v611_v25 = vadd.f32 %v787_v22, %v687_v51  ;;  %v602_v26 = vpop.f32.mrb[11].mxu1 }
 0x289   :  { %v638_v9 = vadd.f32 %v600_v53, %v984_v21  ;;  %v603_v27 = vadd.f32 %v687_v51, %v602_v26 }
 0x28a   :  { %656 = vst [vmem:[#allocation2 + $0x50] sm:$0xff] %v640_v12  ;;  %v641_v11 = vadd.f32 %v611_v25, %v994_v23 }
 0x28b   :  { %654 = vst [vmem:[#allocation2 + $0x40] sm:$0xff] %v638_v9  ;;  %v639_v8 = vadd.f32 %v603_v27, %v979_v20 }
 0x28c   :  { %657 = vst [vmem:[#allocation2 + $0x58] sm:$0xff] %v641_v11 }
 0x28d   :  { %655 = vst [vmem:[#allocation2 + $0x48] sm:$0xff] %v639_v8 }
 0x295   :  { %v790_v42 = vpop.f32.mrb[12].mxu1 }
 0x296   :  { %v624_v43 = vadd.f32 %v790_v42, %v687_v51  ;;  %v615_v44 = vpop.f32.mrb[13].mxu1 }
 0x297   :  { %v616_v45 = vadd.f32 %v687_v51, %v615_v44  ;;  %v791_v46 = vpop.f32.mrb[14].mxu1 }
 0x298   :  { %v644_v24 = vadd.f32 %v624_v43, %v1040_v35  ;;  %v627_v47 = vadd.f32 %v791_v46, %v687_v51  ;;  %v618_v48 = vpop.f32.mrb[15].mxu1 }
 0x299   :  { %v642_v21 = vadd.f32 %v616_v45, %v1028_v33  ;;  %v619_v49 = vadd.f32 %v687_v51, %v618_v48 }
 0x29a   :  { %660 = vst [vmem:[#allocation2 + $0x70] sm:$0xff] %v644_v24  ;;  %v645_v23 = vadd.f32 %v627_v47, %v1035_v34 }
 0x29b   :  { %658 = vst [vmem:[#allocation2 + $0x60] sm:$0xff] %v642_v21  ;;  %v643_v20 = vadd.f32 %v619_v49, %v1023_v32 }
 0x29c   :  { %661 = vst [vmem:[#allocation2 + $0x78] sm:$0xff] %v645_v23 }
 0x29d   :  { %659 = vst [vmem:[#allocation2 + $0x68] sm:$0xff] %v643_v20 }
 0x29e   :  { %854 = shalt.err (!%p851_p4)
}
 0x29f   :  { %s855_s11 = scalar_lea.hbm %s1186_s5, 2048 }
 0x2a0   :  { %p856_p5 = scmp.ne.s32.totalorder %s1186_s5, %s855_s11  ;;  %p859_p6 = scmp.lt.u32.totalorder %s855_s11, %s1186_s5 }
 0x2a2   :  { %p861_p7 = pnand %p859_p6, %p856_p5 }
 0x2a4   :  { %864 = shalt.err (!%p861_p7)
}
 0x2a5   :  { %s868_s0 = smov 128   ;;  %s869_s15 = smov 8  }
 0x2a6   :  { %673 = dma.vmem_to_hbm [thread:$0]  %s668_s7, 2048, %s1186_s5, [#allocation3], %s868_s0, %s868_s0, %s869_s15  }
 0x2a7   :  { %865 = dma.done.wait [#allocation3], 2048  }
 0x2a8   :  { %866 = vsyncadd [#allocation3], 4294965248 }
 0x2a9   :  { %677 = vsyncpa [#allocation3], 1 }

</bundles_post_ra>
